<compile_context>
chip_gen: v5e
topology: v5e:2x2
jax: 0.10.0
libtpu: 0.0.40
codegen_flags: <defaults>
</compile_context>

<pallas_src>
import math
import functools

import jax
import jax.numpy as jnp
import numpy as np
from jax import lax
from jax.experimental import pallas as pl
from jax.experimental.pallas import tpu as pltpu

_NEG_INF = -1e9  # large finite negative for additive masking (avoids inf-inf NaNs)
# Conservative cap that fits v7x's 64 MiB/TC; raise toward ~100 MiB on v5e/v6e.
_VMEM_LIMIT = 48 * 1024 * 1024


# --------------------------------------------------------------------------- #
# Kernel 1: fused QKV projection -> head-major (B, H, S, hd) slabs
# --------------------------------------------------------------------------- #
def _qkv_proj_kernel(x_ref, wq_ref, wk_ref, wv_ref, bq_ref, bk_ref, bv_ref,
                     q_ref, k_ref, v_ref, *, num_heads, head_dim):
    x = x_ref[0]                                                # (ts, D), compute dtype
    for w_ref, b_ref, o_ref in ((wq_ref, bq_ref, q_ref),
                                (wk_ref, bk_ref, k_ref),
                                (wv_ref, bv_ref, v_ref)):
        # Weights are pre-transposed (D, D) and head-major, so this is a single
        # full-width MXU matmul with f32 accumulation + f32 bias.
        y = jnp.dot(x, w_ref[...], preferred_element_type=jnp.float32) + b_ref[0]
        # De-interleave heads with static column slices (once per s-tile).
        for h in range(num_heads):
            lo = h * head_dim
            o_ref[0, h] = y[:, lo:lo + head_dim].astype(o_ref.dtype)


# --------------------------------------------------------------------------- #
# Kernel 2: flash attention (online softmax over KV tiles)
# --------------------------------------------------------------------------- #
def _flash_attn_kernel(*refs, scale, tq, tk, causal, mask_kind, approx_recip):
    if mask_kind is None:
        q_ref, k_ref, v_ref, o_ref, m_sc, l_sc, acc_sc = refs
        mask_ref = None
    else:
        q_ref, k_ref, v_ref, mask_ref, o_ref, m_sc, l_sc, acc_sc = refs

    qi = pl.program_id(2)
    ki = pl.program_id(3)
    last_kv = pl.num_programs(3) - 1

    @pl.when(ki == 0)
    def _():
        m_sc[...] = jnp.full_like(m_sc, -jnp.inf)
        l_sc[...] = jnp.zeros_like(l_sc)
        acc_sc[...] = jnp.zeros_like(acc_sc)

    def compute():
        q = q_ref[0, 0]                                          # (tq, hd)
        k = k_ref[0, 0]                                          # (tk, hd)
        v = v_ref[0, 0]                                          # (tk, hd)
        # q @ k^T without materializing a transpose (contract over head_dim).
        s = lax.dot_general(q, k, (((1,), (1,)), ((), ())),
                            preferred_element_type=jnp.float32)
        s = s * jnp.float32(scale)                               # (tq, tk) f32

        if mask_kind == "additive":
            s = s + mask_ref[...].astype(jnp.float32)
        elif mask_kind == "keep":                                # int8 keep-mask
            s = s + jnp.where(mask_ref[...] != 0,
                              jnp.float32(0.0), jnp.float32(_NEG_INF))
        if causal:                                               # in-kernel causal mask
            rows = qi * tq + lax.broadcasted_iota(jnp.int32, (tq, tk), 0)
            cols = ki * tk + lax.broadcasted_iota(jnp.int32, (tq, tk), 1)
            s = s + jnp.where(cols > rows,
                              jnp.float32(_NEG_INF), jnp.float32(0.0))

        # Online (flash) softmax update, all in f32.
        m_prev = m_sc[...]
        m_new = jnp.maximum(m_prev, jnp.max(s, axis=-1, keepdims=True))
        alpha = jnp.exp(m_prev - m_new)
        p = jnp.exp(s - m_new)
        l_sc[...] = alpha * l_sc[...] + jnp.sum(p, axis=-1, keepdims=True)
        acc_sc[...] = alpha * acc_sc[...] + jnp.dot(
            p.astype(v.dtype), v, preferred_element_type=jnp.float32)
        m_sc[...] = m_new

    if causal:
        # Skip KV tiles that are entirely in the (masked) future of this q tile.
        pl.when(ki * tk <= qi * tq + (tq - 1))(compute)
    else:
        compute()

    @pl.when(ki == last_kv)
    def _():
        if approx_recip:   # bf16 path: EUP reciprocal is nearly free
            out = acc_sc[...] * pl.reciprocal(l_sc[...], approx=True)
        else:              # f32 path: exact division for PyTorch-close numerics
            out = acc_sc[...] / l_sc[...]
        o_ref[0, 0] = out.astype(o_ref.dtype)


# --------------------------------------------------------------------------- #
# Kernel 3: output projection as a reduction over heads
# --------------------------------------------------------------------------- #
def _out_proj_kernel(vals_ref, w_ref, b_ref, o_ref, acc_sc):
    h = pl.program_id(2)

    @pl.when(h == 0)
    def _():
        acc_sc[...] = jnp.zeros_like(acc_sc)

    # (ts, hd) @ (hd, D) accumulated in f32 across the head grid axis.
    acc_sc[...] += jnp.dot(vals_ref[0, 0], w_ref[0],
                           preferred_element_type=jnp.float32)

    @pl.when(h == pl.num_programs(2) - 1)
    def _():
        o_ref[0] = (acc_sc[...] + b_ref[0]).astype(o_ref.dtype)


# --------------------------------------------------------------------------- #
# Wrapper
# --------------------------------------------------------------------------- #
def multi_head_attention(x, w_qkv, b_qkv, w_out, b_out, num_heads,
                         mask=None, causal=False, compute_dtype=jnp.bfloat16):
    """x: (B,S,D); w_qkv: (3D,D); b_qkv: (3D,); w_out: (D,D); b_out: (D,)
    (PyTorch nn.Linear conventions).
    mask: optional (S,S) — boolean/int = keep-mask (nonzero keeps), float = additive.
    causal=True adds an in-kernel causal mask (combined with `mask` if both given)."""
    B, S, D = x.shape
    head_dim = D // num_heads
    assert head_dim * num_heads == D

    # Sequence tile sizes.
    def _tile(n):
        return 128 if n % 128 == 0 else n
    tq, tk, ts = _tile(S), _tile(S), _tile(S)
    n_q, n_k, n_s = S // tq, S // tk, S // ts

    # Cast activations once in the wrapper (halves x DMA for the bf16 path).
    x_c = x if x.dtype == compute_dtype else x.astype(compute_dtype)

    # Split the fused QKV weight into head-major per-part weights, pre-transposed.
    # PyTorch channel layout: c = h*3*hd + part*hd + d.
    idx = np.arange(3 * D).reshape(num_heads, 3, head_dim)
    w_qkv = jnp.asarray(w_qkv)
    b_qkv = jnp.asarray(b_qkv)
    part_w, part_b = [], []
    for p in range(3):
        ch = idx[:, p, :].reshape(D)                               # head-major channels
        part_w.append(jnp.asarray(w_qkv[ch, :].T, dtype=compute_dtype))   # (D, D)
        part_b.append(jnp.asarray(b_qkv[ch], dtype=jnp.float32).reshape(1, D))
    wq_t, wk_t, wv_t = part_w
    bq, bk, bv = part_b

    w_out_r = jnp.asarray(jnp.asarray(w_out).T.reshape(num_heads, head_dim, D),
                          dtype=compute_dtype)                     # (H, hd, D)
    b_out2 = jnp.asarray(b_out, dtype=jnp.float32).reshape(1, D)

    # ---- 1) QKV projection ----
    qkv_shape = jax.ShapeDtypeStruct((B, num_heads, S, head_dim), compute_dtype)
    proj_kernel = functools.partial(_qkv_proj_kernel,
                                    num_heads=num_heads, head_dim=head_dim)
    q, k, v = pl.pallas_call(
        proj_kernel,
        out_shape=(qkv_shape, qkv_shape, qkv_shape),
        grid_spec=pltpu.PrefetchScalarGridSpec(
            num_scalar_prefetch=0,
            grid=(B, n_s),
            in_specs=[
                pl.BlockSpec((1, ts, D), lambda b, si: (b, si, 0)),   # x tile
                pl.BlockSpec((D, D), lambda b, si: (0, 0)),           # Wq^T
                pl.BlockSpec((D, D), lambda b, si: (0, 0)),           # Wk^T
                pl.BlockSpec((D, D), lambda b, si: (0, 0)),           # Wv^T
                pl.BlockSpec((1, D), lambda b, si: (0, 0)),           # bq
                pl.BlockSpec((1, D), lambda b, si: (0, 0)),           # bk
                pl.BlockSpec((1, D), lambda b, si: (0, 0)),           # bv
            ],
            out_specs=[
                pl.BlockSpec((1, num_heads, ts, head_dim), lambda b, si: (b, 0, si, 0)),
                pl.BlockSpec((1, num_heads, ts, head_dim), lambda b, si: (b, 0, si, 0)),
                pl.BlockSpec((1, num_heads, ts, head_dim), lambda b, si: (b, 0, si, 0)),
            ]),
        compiler_params=pltpu.CompilerParams(
            dimension_semantics=("parallel", "parallel"),
            vmem_limit_bytes=_VMEM_LIMIT),
    )(x_c, wq_t, wk_t, wv_t, bq, bk, bv)

    # ---- 2) flash attention ----
    mask_kind = None
    mask_args = []
    attn_in_specs = [
        pl.BlockSpec((1, 1, tq, head_dim), lambda b, h, qi, ki: (b, h, qi, 0)),
        pl.BlockSpec((1, 1, tk, head_dim), lambda b, h, qi, ki: (b, h, ki, 0)),
        pl.BlockSpec((1, 1, tk, head_dim), lambda b, h, qi, ki: (b, h, ki, 0)),
    ]
    if mask is not None:
        m = jnp.asarray(mask)
        assert m.shape == (S, S), "mask must have shape (S, S)"
        if jnp.issubdtype(m.dtype, jnp.floating):
            mask_kind = "additive"
            mask_args = [m.astype(jnp.float32)]
        else:
            mask_kind = "keep"                       # int8 keep-mask: 4x less DMA
            mask_args = [m.astype(jnp.int8)]
        attn_in_specs.append(
            pl.BlockSpec((tq, tk), lambda b, h, qi, ki: (qi, ki)))

    attn_kernel = functools.partial(
        _flash_attn_kernel,
        scale=1.0 / math.sqrt(head_dim), tq=tq, tk=tk, causal=causal,
        mask_kind=mask_kind, approx_recip=(compute_dtype != jnp.float32))

    values = pl.pallas_call(
        attn_kernel,
        out_shape=jax.ShapeDtypeStruct((B, num_heads, S, head_dim), compute_dtype),
        grid_spec=pltpu.PrefetchScalarGridSpec(
            num_scalar_prefetch=0,
            grid=(B, num_heads, n_q, n_k),
            in_specs=attn_in_specs,
            out_specs=pl.BlockSpec((1, 1, tq, head_dim),
                                   lambda b, h, qi, ki: (b, h, qi, 0)),
            scratch_shapes=[
                pltpu.VMEM((tq, 1), jnp.float32),         # running max
                pltpu.VMEM((tq, 1), jnp.float32),         # running denominator
                pltpu.VMEM((tq, head_dim), jnp.float32),  # output accumulator
            ]),
        compiler_params=pltpu.CompilerParams(
            # KV axis is the online-softmax reduction -> must stay sequential.
            dimension_semantics=("parallel", "parallel", "parallel", "arbitrary"),
            vmem_limit_bytes=_VMEM_LIMIT),
    )(q, k, v, *mask_args)

    # ---- 3) output projection (reduction over heads) ----
    out = pl.pallas_call(
        _out_proj_kernel,
        out_shape=jax.ShapeDtypeStruct((B, S, D), x.dtype),
        grid_spec=pltpu.PrefetchScalarGridSpec(
            num_scalar_prefetch=0,
            grid=(B, n_s, num_heads),
            in_specs=[
                pl.BlockSpec((1, 1, ts, head_dim), lambda b, si, h: (b, h, si, 0)),
                pl.BlockSpec((1, head_dim, D), lambda b, si, h: (h, 0, 0)),
                pl.BlockSpec((1, D), lambda b, si, h: (0, 0)),
            ],
            out_specs=pl.BlockSpec((1, ts, D), lambda b, si, h: (b, si, 0)),
            scratch_shapes=[pltpu.VMEM((ts, D), jnp.float32)]),
        compiler_params=pltpu.CompilerParams(
            dimension_semantics=("parallel", "parallel", "arbitrary"),
            vmem_limit_bytes=_VMEM_LIMIT),
    )(values, w_out_r, b_out2)

    return out


# --------------------------------------------------------------------------- #
# Pure-JAX reference mirroring the PyTorch module
# --------------------------------------------------------------------------- #
def _reference_mha(x, w_qkv, b_qkv, w_out, b_out, num_heads, mask=None,
                   compute_dtype=jnp.float32):
    B, S, D = x.shape
    hd = D // num_heads
    c = lambda a: a.astype(compute_dtype)
    qkv = jnp.dot(c(x), c(w_qkv).T, preferred_element_type=jnp.float32) + b_qkv
    qkv = qkv.astype(compute_dtype)
    qkv = qkv.reshape(B, S, num_heads, 3 * hd).transpose(0, 2, 1, 3)
    q, k, v = qkv[..., :hd], qkv[..., hd:2 * hd], qkv[..., 2 * hd:]
    scaled = jnp.einsum("bhqd,bhkd->bhqk", q, k,
                        preferred_element_type=jnp.float32) / math.sqrt(hd)
    if mask is not None:
        scaled = scaled + mask
    attn = jax.nn.softmax(scaled, axis=-1)
    vals = jnp.einsum("bhqk,bhkd->bhqd", c(attn), v,
                      preferred_element_type=jnp.float32)
    vals = vals.transpose(0, 2, 1, 3).reshape(B, S, D).astype(compute_dtype)
    return jnp.dot(vals, c(w_out).T, preferred_element_type=jnp.float32) + b_out


if __name__ == "__main__":
    B, S, D = 2, 8, 32
    num_heads = 4

    key = jax.random.PRNGKey(0)
    kx, kw1, kb1, kw2, kb2, km = jax.random.split(key, 6)

    x = jax.random.normal(kx, (B, S, D), dtype=jnp.float32)
    w_qkv = jax.random.normal(kw1, (3 * D, D), dtype=jnp.float32) / math.sqrt(D)
    b_qkv = jax.random.normal(kb1, (3 * D,), dtype=jnp.float32) * 0.01
    w_out = jax.random.normal(kw2, (D, D), dtype=jnp.float32) / math.sqrt(D)
    b_out = jax.random.normal(kb2, (D,), dtype=jnp.float32) * 0.01

    # 1) no mask, f32 compute (exact PyTorch semantics, exact softmax division)
    out = jax.block_until_ready(
        multi_head_attention(x, w_qkv, b_qkv, w_out, b_out, num_heads,
                             compute_dtype=jnp.float32))
    ref = _reference_mha(x, w_qkv, b_qkv, w_out, b_out, num_heads)
    np.testing.assert_allclose(np.asarray(out), np.asarray(ref),
                               atol=5e-3, rtol=5e-3)

    # 2) in-kernel causal mask (+ masked KV-tile skipping), bf16 MXU path
    out_c = jax.block_until_ready(
        multi_head_attention(x, w_qkv, b_qkv, w_out, b_out, num_heads,
                             causal=True, compute_dtype=jnp.bfloat16))
    r = np.arange(S)
    causal_mask = jnp.asarray(np.where(r[None, :] > r[:, None], _NEG_INF, 0.0),
                              dtype=jnp.float32)
    ref_c = _reference_mha(x, w_qkv, b_qkv, w_out, b_out, num_heads,
                           mask=causal_mask, compute_dtype=jnp.bfloat16)
    np.testing.assert_allclose(np.asarray(out_c), np.asarray(ref_c),
                               atol=3e-2, rtol=3e-2)

    # 3) boolean keep-mask -> int8 DMA path, f32 compute
    keep = jax.random.uniform(km, (S, S)) <= 0.5
    add_mask = jnp.where(keep, 0.0, _NEG_INF).astype(jnp.float32)
    out_b = jax.block_until_ready(
        multi_head_attention(x, w_qkv, b_qkv, w_out, b_out, num_heads,
                             mask=keep, compute_dtype=jnp.float32))
    ref_m = _reference_mha(x, w_qkv, b_qkv, w_out, b_out, num_heads, mask=add_mask)
    np.testing.assert_allclose(np.asarray(out_b), np.asarray(ref_m),
                               atol=5e-3, rtol=5e-3)

    # 4) explicit additive f32 mask path, f32 compute
    out_m = jax.block_until_ready(
        multi_head_attention(x, w_qkv, b_qkv, w_out, b_out, num_heads,
                             mask=add_mask, compute_dtype=jnp.float32))
    np.testing.assert_allclose(np.asarray(out_m), np.asarray(ref_m),
                               atol=5e-3, rtol=5e-3)

    print("KERNEL_OK")
</pallas_src>

<mosaic_0001>
module attributes {stable_mosaic.version = 11 : i64} {
  func.func @_qkv_proj_kernel(%arg0: i32, %arg1: i32, %arg2: memref<1x8x32xf32, #tpu.memory_space<vmem>>, %arg3: memref<32x32xf32, #tpu.memory_space<vmem>>, %arg4: memref<32x32xf32, #tpu.memory_space<vmem>>, %arg5: memref<32x32xf32, #tpu.memory_space<vmem>>, %arg6: memref<1x32xf32, #tpu.memory_space<vmem>>, %arg7: memref<1x32xf32, #tpu.memory_space<vmem>>, %arg8: memref<1x32xf32, #tpu.memory_space<vmem>>, %arg9: memref<1x4x8x8xf32, #tpu.memory_space<vmem>>, %arg10: memref<1x4x8x8xf32, #tpu.memory_space<vmem>>, %arg11: memref<1x4x8x8xf32, #tpu.memory_space<vmem>>) attributes {dimension_semantics = [#tpu.dimension_semantics<parallel>, #tpu.dimension_semantics<parallel>], iteration_bounds = array<i64: 2, 1>, scalar_prefetch = 0 : i64, scratch_operands = 0 : i64, tpu.core_type = #tpu.core_type<tc>, window_params = [{transform_indices = @transform_0, window_bounds = array<i64: 1, 8, 32>}, {pipeline_mode = #tpu.pipeline_mode<synchronous>, transform_indices = @transform_1, window_bounds = array<i64: 32, 32>}, {pipeline_mode = #tpu.pipeline_mode<synchronous>, transform_indices = @transform_2, window_bounds = array<i64: 32, 32>}, {pipeline_mode = #tpu.pipeline_mode<synchronous>, transform_indices = @transform_3, window_bounds = array<i64: 32, 32>}, {pipeline_mode = #tpu.pipeline_mode<synchronous>, transform_indices = @transform_4, window_bounds = array<i64: 1, 32>}, {pipeline_mode = #tpu.pipeline_mode<synchronous>, transform_indices = @transform_5, window_bounds = array<i64: 1, 32>}, {pipeline_mode = #tpu.pipeline_mode<synchronous>, transform_indices = @transform_6, window_bounds = array<i64: 1, 32>}, {transform_indices = @transform_7, window_bounds = array<i64: 1, 4, 8, 8>}, {transform_indices = @transform_8, window_bounds = array<i64: 1, 4, 8, 8>}, {transform_indices = @transform_9, window_bounds = array<i64: 1, 4, 8, 8>}]} {
    %c0 = arith.constant 0 : index
    %c0_0 = arith.constant 0 : index
    %c0_1 = arith.constant 0 : index
    %0 = vector.load %arg2[%c0, %c0_0, %c0_1] : memref<1x8x32xf32, #tpu.memory_space<vmem>>, vector<1x8x32xf32>
    %1 = vector.shape_cast %0 : vector<1x8x32xf32> to vector<8x32xf32>
    %c0_2 = arith.constant 0 : index
    %c0_3 = arith.constant 0 : index
    %2 = vector.load %arg3[%c0_2, %c0_3] : memref<32x32xf32, #tpu.memory_space<vmem>>, vector<32x32xf32>
    %cst = arith.constant dense<0.000000e+00> : vector<8x32xf32>
    %3 = tpu.matmul %1, %2, %cst {dimension_numbers = #tpu.dot_dimension_numbers<[1], [0], [0], [1], [0, 0, 1, 1], [], []>} : vector<8x32xf32>, vector<32x32xf32>, vector<8x32xf32> -> vector<8x32xf32>
    %c0_4 = arith.constant 0 : index
    %c0_5 = arith.constant 0 : index
    %4 = vector.load %arg6[%c0_4, %c0_5] : memref<1x32xf32, #tpu.memory_space<vmem>>, vector<1x32xf32>
    %5 = vector.shape_cast %4 : vector<1x32xf32> to vector<32xf32>
    %6 = vector.shape_cast %5 : vector<32xf32> to vector<1x32xf32>
    %7 = vector.broadcast %6 : vector<1x32xf32> to vector<8x32xf32>
    %8 = arith.addf %3, %7 : vector<8x32xf32>
    %9 = vector.extract_strided_slice %8 {offsets = [0, 0], sizes = [8, 8], strides = [1, 1]} : vector<8x32xf32> to vector<8x8xf32>
    %c0_6 = arith.constant 0 : index
    %c0_7 = arith.constant 0 : index
    %c0_8 = arith.constant 0 : index
    %c0_9 = arith.constant 0 : index
    %10 = vector.load %arg9[%c0_6, %c0_7, %c0_8, %c0_9] : memref<1x4x8x8xf32, #tpu.memory_space<vmem>>, vector<1x1x8x8xf32>
    %11 = vector.shape_cast %10 : vector<1x1x8x8xf32> to vector<8x8xf32>
    %12 = vector.shape_cast %9 : vector<8x8xf32> to vector<1x1x8x8xf32>
    tpu.vector_store %arg9[%c0_6, %c0_7, %c0_8, %c0_9], %12 {strides = array<i32>} : memref<1x4x8x8xf32, #tpu.memory_space<vmem>>, vector<1x1x8x8xf32>,
    %13 = vector.extract_strided_slice %8 {offsets = [0, 8], sizes = [8, 8], strides = [1, 1]} : vector<8x32xf32> to vector<8x8xf32>
    %c0_10 = arith.constant 0 : index
    %c1 = arith.constant 1 : index
    %c0_11 = arith.constant 0 : index
    %c0_12 = arith.constant 0 : index
    %14 = vector.load %arg9[%c0_10, %c1, %c0_11, %c0_12] : memref<1x4x8x8xf32, #tpu.memory_space<vmem>>, vector<1x1x8x8xf32>
    %15 = vector.shape_cast %14 : vector<1x1x8x8xf32> to vector<8x8xf32>
    %16 = vector.shape_cast %13 : vector<8x8xf32> to vector<1x1x8x8xf32>
    tpu.vector_store %arg9[%c0_10, %c1, %c0_11, %c0_12], %16 {strides = array<i32>} : memref<1x4x8x8xf32, #tpu.memory_space<vmem>>, vector<1x1x8x8xf32>,
    %17 = vector.extract_strided_slice %8 {offsets = [0, 16], sizes = [8, 8], strides = [1, 1]} : vector<8x32xf32> to vector<8x8xf32>
    %c0_13 = arith.constant 0 : index
    %c2 = arith.constant 2 : index
    %c0_14 = arith.constant 0 : index
    %c0_15 = arith.constant 0 : index
    %18 = vector.load %arg9[%c0_13, %c2, %c0_14, %c0_15] : memref<1x4x8x8xf32, #tpu.memory_space<vmem>>, vector<1x1x8x8xf32>
    %19 = vector.shape_cast %18 : vector<1x1x8x8xf32> to vector<8x8xf32>
    %20 = vector.shape_cast %17 : vector<8x8xf32> to vector<1x1x8x8xf32>
    tpu.vector_store %arg9[%c0_13, %c2, %c0_14, %c0_15], %20 {strides = array<i32>} : memref<1x4x8x8xf32, #tpu.memory_space<vmem>>, vector<1x1x8x8xf32>,
    %21 = vector.extract_strided_slice %8 {offsets = [0, 24], sizes = [8, 8], strides = [1, 1]} : vector<8x32xf32> to vector<8x8xf32>
    %c0_16 = arith.constant 0 : index
    %c3 = arith.constant 3 : index
    %c0_17 = arith.constant 0 : index
    %c0_18 = arith.constant 0 : index
    %22 = vector.load %arg9[%c0_16, %c3, %c0_17, %c0_18] : memref<1x4x8x8xf32, #tpu.memory_space<vmem>>, vector<1x1x8x8xf32>
    %23 = vector.shape_cast %22 : vector<1x1x8x8xf32> to vector<8x8xf32>
    %24 = vector.shape_cast %21 : vector<8x8xf32> to vector<1x1x8x8xf32>
    tpu.vector_store %arg9[%c0_16, %c3, %c0_17, %c0_18], %24 {strides = array<i32>} : memref<1x4x8x8xf32, #tpu.memory_space<vmem>>, vector<1x1x8x8xf32>,
    %c0_19 = arith.constant 0 : index
    %c0_20 = arith.constant 0 : index
    %25 = vector.load %arg4[%c0_19, %c0_20] : memref<32x32xf32, #tpu.memory_space<vmem>>, vector<32x32xf32>
    %cst_21 = arith.constant dense<0.000000e+00> : vector<8x32xf32>
    %26 = tpu.matmul %1, %25, %cst_21 {dimension_numbers = #tpu.dot_dimension_numbers<[1], [0], [0], [1], [0, 0, 1, 1], [], []>} : vector<8x32xf32>, vector<32x32xf32>, vector<8x32xf32> -> vector<8x32xf32>
    %c0_22 = arith.constant 0 : index
    %c0_23 = arith.constant 0 : index
    %27 = vector.load %arg7[%c0_22, %c0_23] : memref<1x32xf32, #tpu.memory_space<vmem>>, vector<1x32xf32>
    %28 = vector.shape_cast %27 : vector<1x32xf32> to vector<32xf32>
    %29 = vector.shape_cast %28 : vector<32xf32> to vector<1x32xf32>
    %30 = vector.broadcast %29 : vector<1x32xf32> to vector<8x32xf32>
    %31 = arith.addf %26, %30 : vector<8x32xf32>
    %32 = vector.extract_strided_slice %31 {offsets = [0, 0], sizes = [8, 8], strides = [1, 1]} : vector<8x32xf32> to vector<8x8xf32>
    %c0_24 = arith.constant 0 : index
    %c0_25 = arith.constant 0 : index
    %c0_26 = arith.constant 0 : index
    %c0_27 = arith.constant 0 : index
    %33 = vector.load %arg10[%c0_24, %c0_25, %c0_26, %c0_27] : memref<1x4x8x8xf32, #tpu.memory_space<vmem>>, vector<1x1x8x8xf32>
    %34 = vector.shape_cast %33 : vector<1x1x8x8xf32> to vector<8x8xf32>
    %35 = vector.shape_cast %32 : vector<8x8xf32> to vector<1x1x8x8xf32>
    tpu.vector_store %arg10[%c0_24, %c0_25, %c0_26, %c0_27], %35 {strides = array<i32>} : memref<1x4x8x8xf32, #tpu.memory_space<vmem>>, vector<1x1x8x8xf32>,
    %36 = vector.extract_strided_slice %31 {offsets = [0, 8], sizes = [8, 8], strides = [1, 1]} : vector<8x32xf32> to vector<8x8xf32>
    %c0_28 = arith.constant 0 : index
    %c1_29 = arith.constant 1 : index
    %c0_30 = arith.constant 0 : index
    %c0_31 = arith.constant 0 : index
    %37 = vector.load %arg10[%c0_28, %c1_29, %c0_30, %c0_31] : memref<1x4x8x8xf32, #tpu.memory_space<vmem>>, vector<1x1x8x8xf32>
    %38 = vector.shape_cast %37 : vector<1x1x8x8xf32> to vector<8x8xf32>
    %39 = vector.shape_cast %36 : vector<8x8xf32> to vector<1x1x8x8xf32>
    tpu.vector_store %arg10[%c0_28, %c1_29, %c0_30, %c0_31], %39 {strides = array<i32>} : memref<1x4x8x8xf32, #tpu.memory_space<vmem>>, vector<1x1x8x8xf32>,
    %40 = vector.extract_strided_slice %31 {offsets = [0, 16], sizes = [8, 8], strides = [1, 1]} : vector<8x32xf32> to vector<8x8xf32>
    %c0_32 = arith.constant 0 : index
    %c2_33 = arith.constant 2 : index
    %c0_34 = arith.constant 0 : index
    %c0_35 = arith.constant 0 : index
    %41 = vector.load %arg10[%c0_32, %c2_33, %c0_34, %c0_35] : memref<1x4x8x8xf32, #tpu.memory_space<vmem>>, vector<1x1x8x8xf32>
    %42 = vector.shape_cast %41 : vector<1x1x8x8xf32> to vector<8x8xf32>
    %43 = vector.shape_cast %40 : vector<8x8xf32> to vector<1x1x8x8xf32>
    tpu.vector_store %arg10[%c0_32, %c2_33, %c0_34, %c0_35], %43 {strides = array<i32>} : memref<1x4x8x8xf32, #tpu.memory_space<vmem>>, vector<1x1x8x8xf32>,
    %44 = vector.extract_strided_slice %31 {offsets = [0, 24], sizes = [8, 8], strides = [1, 1]} : vector<8x32xf32> to vector<8x8xf32>
    %c0_36 = arith.constant 0 : index
    %c3_37 = arith.constant 3 : index
    %c0_38 = arith.constant 0 : index
    %c0_39 = arith.constant 0 : index
    %45 = vector.load %arg10[%c0_36, %c3_37, %c0_38, %c0_39] : memref<1x4x8x8xf32, #tpu.memory_space<vmem>>, vector<1x1x8x8xf32>
    %46 = vector.shape_cast %45 : vector<1x1x8x8xf32> to vector<8x8xf32>
    %47 = vector.shape_cast %44 : vector<8x8xf32> to vector<1x1x8x8xf32>
    tpu.vector_store %arg10[%c0_36, %c3_37, %c0_38, %c0_39], %47 {strides = array<i32>} : memref<1x4x8x8xf32, #tpu.memory_space<vmem>>, vector<1x1x8x8xf32>,
    %c0_40 = arith.constant 0 : index
    %c0_41 = arith.constant 0 : index
    %48 = vector.load %arg5[%c0_40, %c0_41] : memref<32x32xf32, #tpu.memory_space<vmem>>, vector<32x32xf32>
    %cst_42 = arith.constant dense<0.000000e+00> : vector<8x32xf32>
    %49 = tpu.matmul %1, %48, %cst_42 {dimension_numbers = #tpu.dot_dimension_numbers<[1], [0], [0], [1], [0, 0, 1, 1], [], []>} : vector<8x32xf32>, vector<32x32xf32>, vector<8x32xf32> -> vector<8x32xf32>
    %c0_43 = arith.constant 0 : index
    %c0_44 = arith.constant 0 : index
    %50 = vector.load %arg8[%c0_43, %c0_44] : memref<1x32xf32, #tpu.memory_space<vmem>>, vector<1x32xf32>
    %51 = vector.shape_cast %50 : vector<1x32xf32> to vector<32xf32>
    %52 = vector.shape_cast %51 : vector<32xf32> to vector<1x32xf32>
    %53 = vector.broadcast %52 : vector<1x32xf32> to vector<8x32xf32>
    %54 = arith.addf %49, %53 : vector<8x32xf32>
    %55 = vector.extract_strided_slice %54 {offsets = [0, 0], sizes = [8, 8], strides = [1, 1]} : vector<8x32xf32> to vector<8x8xf32>
    %c0_45 = arith.constant 0 : index
    %c0_46 = arith.constant 0 : index
    %c0_47 = arith.constant 0 : index
    %c0_48 = arith.constant 0 : index
    %56 = vector.load %arg11[%c0_45, %c0_46, %c0_47, %c0_48] : memref<1x4x8x8xf32, #tpu.memory_space<vmem>>, vector<1x1x8x8xf32>
    %57 = vector.shape_cast %56 : vector<1x1x8x8xf32> to vector<8x8xf32>
    %58 = vector.shape_cast %55 : vector<8x8xf32> to vector<1x1x8x8xf32>
    tpu.vector_store %arg11[%c0_45, %c0_46, %c0_47, %c0_48], %58 {strides = array<i32>} : memref<1x4x8x8xf32, #tpu.memory_space<vmem>>, vector<1x1x8x8xf32>,
    %59 = vector.extract_strided_slice %54 {offsets = [0, 8], sizes = [8, 8], strides = [1, 1]} : vector<8x32xf32> to vector<8x8xf32>
    %c0_49 = arith.constant 0 : index
    %c1_50 = arith.constant 1 : index
    %c0_51 = arith.constant 0 : index
    %c0_52 = arith.constant 0 : index
    %60 = vector.load %arg11[%c0_49, %c1_50, %c0_51, %c0_52] : memref<1x4x8x8xf32, #tpu.memory_space<vmem>>, vector<1x1x8x8xf32>
    %61 = vector.shape_cast %60 : vector<1x1x8x8xf32> to vector<8x8xf32>
    %62 = vector.shape_cast %59 : vector<8x8xf32> to vector<1x1x8x8xf32>
    tpu.vector_store %arg11[%c0_49, %c1_50, %c0_51, %c0_52], %62 {strides = array<i32>} : memref<1x4x8x8xf32, #tpu.memory_space<vmem>>, vector<1x1x8x8xf32>,
    %63 = vector.extract_strided_slice %54 {offsets = [0, 16], sizes = [8, 8], strides = [1, 1]} : vector<8x32xf32> to vector<8x8xf32>
    %c0_53 = arith.constant 0 : index
    %c2_54 = arith.constant 2 : index
    %c0_55 = arith.constant 0 : index
    %c0_56 = arith.constant 0 : index
    %64 = vector.load %arg11[%c0_53, %c2_54, %c0_55, %c0_56] : memref<1x4x8x8xf32, #tpu.memory_space<vmem>>, vector<1x1x8x8xf32>
    %65 = vector.shape_cast %64 : vector<1x1x8x8xf32> to vector<8x8xf32>
    %66 = vector.shape_cast %63 : vector<8x8xf32> to vector<1x1x8x8xf32>
    tpu.vector_store %arg11[%c0_53, %c2_54, %c0_55, %c0_56], %66 {strides = array<i32>} : memref<1x4x8x8xf32, #tpu.memory_space<vmem>>, vector<1x1x8x8xf32>,
    %67 = vector.extract_strided_slice %54 {offsets = [0, 24], sizes = [8, 8], strides = [1, 1]} : vector<8x32xf32> to vector<8x8xf32>
    %c0_57 = arith.constant 0 : index
    %c3_58 = arith.constant 3 : index
    %c0_59 = arith.constant 0 : index
    %c0_60 = arith.constant 0 : index
    %68 = vector.load %arg11[%c0_57, %c3_58, %c0_59, %c0_60] : memref<1x4x8x8xf32, #tpu.memory_space<vmem>>, vector<1x1x8x8xf32>
    %69 = vector.shape_cast %68 : vector<1x1x8x8xf32> to vector<8x8xf32>
    %70 = vector.shape_cast %67 : vector<8x8xf32> to vector<1x1x8x8xf32>
    tpu.vector_store %arg11[%c0_57, %c3_58, %c0_59, %c0_60], %70 {strides = array<i32>} : memref<1x4x8x8xf32, #tpu.memory_space<vmem>>, vector<1x1x8x8xf32>,
    return
  }
  func.func @transform_0(%arg0: i32, %arg1: i32) -> (i32, i32, i32) {
    %c0_i32 = arith.constant 0 : i32
    %c0_i32_0 = arith.constant 0 : i32
    return %arg0, %arg1, %c0_i32 : i32, i32, i32
  }
  func.func @transform_1(%arg0: i32, %arg1: i32) -> (i32, i32) {
    %c0_i32 = arith.constant 0 : i32
    %c0_i32_0 = arith.constant 0 : i32
    %c0_i32_1 = arith.constant 0 : i32
    return %c0_i32, %c0_i32_0 : i32, i32
  }
  func.func @transform_2(%arg0: i32, %arg1: i32) -> (i32, i32) {
    %c0_i32 = arith.constant 0 : i32
    %c0_i32_0 = arith.constant 0 : i32
    %c0_i32_1 = arith.constant 0 : i32
    return %c0_i32, %c0_i32_0 : i32, i32
  }
  func.func @transform_3(%arg0: i32, %arg1: i32) -> (i32, i32) {
    %c0_i32 = arith.constant 0 : i32
    %c0_i32_0 = arith.constant 0 : i32
    %c0_i32_1 = arith.constant 0 : i32
    return %c0_i32, %c0_i32_0 : i32, i32
  }
  func.func @transform_4(%arg0: i32, %arg1: i32) -> (i32, i32) {
    %c0_i32 = arith.constant 0 : i32
    %c0_i32_0 = arith.constant 0 : i32
    %c0_i32_1 = arith.constant 0 : i32
    return %c0_i32, %c0_i32_0 : i32, i32
  }
  func.func @transform_5(%arg0: i32, %arg1: i32) -> (i32, i32) {
    %c0_i32 = arith.constant 0 : i32
    %c0_i32_0 = arith.constant 0 : i32
    %c0_i32_1 = arith.constant 0 : i32
    return %c0_i32, %c0_i32_0 : i32, i32
  }
  func.func @transform_6(%arg0: i32, %arg1: i32) -> (i32, i32) {
    %c0_i32 = arith.constant 0 : i32
    %c0_i32_0 = arith.constant 0 : i32
    %c0_i32_1 = arith.constant 0 : i32
    return %c0_i32, %c0_i32_0 : i32, i32
  }
  func.func @transform_7(%arg0: i32, %arg1: i32) -> (i32, i32, i32, i32) {
    %c0_i32 = arith.constant 0 : i32
    %c0_i32_0 = arith.constant 0 : i32
    %c0_i32_1 = arith.constant 0 : i32
    return %arg0, %c0_i32, %arg1, %c0_i32_0 : i32, i32, i32, i32
  }
  func.func @transform_8(%arg0: i32, %arg1: i32) -> (i32, i32, i32, i32) {
    %c0_i32 = arith.constant 0 : i32
    %c0_i32_0 = arith.constant 0 : i32
    %c0_i32_1 = arith.constant 0 : i32
    return %arg0, %c0_i32, %arg1, %c0_i32_0 : i32, i32, i32, i32
  }
  func.func @transform_9(%arg0: i32, %arg1: i32) -> (i32, i32, i32, i32) {
    %c0_i32 = arith.constant 0 : i32
    %c0_i32_0 = arith.constant 0 : i32
    %c0_i32_1 = arith.constant 0 : i32
    return %arg0, %c0_i32, %arg1, %c0_i32_0 : i32, i32, i32, i32
  }
}

</mosaic_0001>

<bundles_post_ra>
// kernel: tpu_custom_call.1
= control target key start
LH: loop header
LB: loop body
LE: loop exit
PB: predicated region body
PF: predicated region fallthrough
CT: control target
= control target key end

     0   :  { %s1584_s0 = inlined_call_operand.hbm [shape: f32[2,8,32], index: 0, kind: input, shape index: {}]   ;;  %s1585_s1 = inlined_call_operand.hbm [shape: f32[32,32], index: 1, kind: input, shape index: {}]   ;;  %s1586_s2 = inlined_call_operand.hbm [shape: f32[32,32], index: 2, kind: input, shape index: {}]   ;;  %s1587_s3 = inlined_call_operand.hbm [shape: f32[32,32], index: 3, kind: input, shape index: {}]   ;;  %s1588_s4 = inlined_call_operand.vmem [shape: f32[1,32], index: 4, kind: input, shape index: {}]   ;;  %s1589_s5 = inlined_call_operand.vmem [shape: f32[1,32], index: 5, kind: input, shape index: {}]   ;;  %s1590_s6 = inlined_call_operand.vmem [shape: f32[1,32], index: 6, kind: input, shape index: {}]   ;;  %s1591_s7 = inlined_call_operand.hbm [shape: f32[2,4,8,8], index: 7, kind: output, shape index: {0}]   ;;  %s1592_s8 = inlined_call_operand.hbm [shape: f32[2,4,8,8], index: 8, kind: output, shape index: {1}]   ;;  %s1593_s9 = inlined_call_operand.hbm [shape: f32[2,4,8,8], index: 9, kind: output, shape index: {2}]  }
   0x1   :  { %1598 = sst [smem:[#allocation21_spill]] %s1584_s0 }
   0x2   :  { %1599 = sst [smem:[#allocation22_spill]] %s1585_s1 }
   0x3   :  { %1600 = sst [smem:[#allocation23_spill]] %s1586_s2 }
   0x4   :  { %1601 = sst [smem:[#allocation24_spill]] %s1587_s3 }
   0x5   :  { %1602 = sst [smem:[#allocation25_spill]] %s1588_s4 }
   0x6   :  { %1603 = sst [smem:[#allocation26_spill]] %s1589_s5 }
   0x7   :  { %15 = vsyncpa [#allocation3], 0 }
   0x8   :  { %17 = vsyncpa [#allocation3 + $0x1], 0 }
   0x9   :  { %18 = vsyncpa [#allocation6], 0 }
   0xa   :  { %19 = vsyncpa [#allocation9], 0 }
   0xb   :  { %20 = vsyncpa [#allocation4], 0 }
   0xc   :  { %22 = vsyncpa [#allocation4 + $0x1], 0 }
   0xd   :  { %23 = vsyncpa [#allocation12], 0 }
   0xe   :  { %25 = vsyncpa [#allocation12 + $0x1], 0  ;;  %s1311_s30 = smov 0   ;;  %s1313_s10 = smov 0  }
   0xf   :  { %s1315_s11 = smov 0   ;;  %s1317_s12 = smov 0  }
  0x10   :  { %s1319_s13 = smov 0   ;;  %s1321_s14 = smov 0  }
  0x11 LB: > { %s1342_s15 = sadd.s32 4294967295, %s1249_s14   ;;  %p825_p0 = scmp.ge.s32.totalorder %s1249_s14, 1  ;;  %s1249_s14 = sphi %s1321_s14, %s31_s14   ;;  %s1245_s13 = sphi %s1319_s13, %s1628_s13   ;;  %s1241_s12 = sphi %s1317_s12, %s1627_s12   ;;  %s1237_s11 = sphi %s1315_s11, %s1626_s11   ;;  %s1233_s10 = sphi %s1313_s10, %s1625_s10   ;;  %s1229_s30 = sphi %s1311_s30, %s1624_s30  }
  0x12   : > { %p66_p1 = scmp.eq.s32.totalorder %s1342_s15, 0  ;;  %p286_p2 = scmp.lt.s32.totalorder %s1249_s14, 3 }
  0x13   : > { %s1604_s1 = sld [smem:[#allocation22_spill]]  ;;  %s1251_s20 = smov [#allocation5]  }
  0x14   : > { %p1350_p3 = pnand %p825_p0, %p286_p2  ;;  %s299_s21 = sshll.u32 %s1251_s20, 4  ;;  %s300_s21 = int_to_ptr.vmem [resolvable:$true] %s299_s21 }
  0x15   : > { %p829_p6 = scmp.ge.s32.totalorder %s1249_s14, 2  ;;  %s1607_s2 = sld [smem:[#allocation23_spill]] }
  0x16   : > { %p886_p4 = pneg %p1350_p3  ;;  %s1252_s26 = smov 128  }
  0x17   : > { %s1253_s27 = smov 8   ;;  %s1254_s28 = smov [#allocation7]  }
  0x18   : > { %p1358_p5 = pnand %p886_p4, %p66_p1  ;;  %s313_s29 = sshll.u32 %s1254_s28, 4  ;;  %s314_s29 = int_to_ptr.vmem [resolvable:$true] %s313_s29 }
  0x19   : > { %s297_s18 = sshll.u32 %s1604_s1, 4  ;;  %s1608_s3 = sld [smem:[#allocation24_spill]]  ;;  %s298_s18 = int_to_ptr.hbm [resolvable:$true] %s297_s18 }
  0x1a   : > { %889 = dma.hbm_to_vmem [thread:$0]  (!%p1358_p5), %s298_s18, 512, %s300_s21, [#allocation6], %s1252_s26, %s1252_s26, %s1253_s27  }
  0x1b   : > { %s311_s25 = sshll.u32 %s1607_s2, 4  ;;  %s1255_s23 = smov [#allocation8]   ;;  %s312_s25 = int_to_ptr.hbm [resolvable:$true] %s311_s25 }
  0x1c   : > { %892 = dma.hbm_to_vmem [thread:$0]  (!%p1358_p5), %s312_s25, 512, %s314_s29, [#allocation6], %s1252_s26, %s1252_s26, %s1253_s27  }
  0x1d   : > { %s327_s24 = sshll.u32 %s1255_s23, 4  ;;  %s1594_s18 = sadd.s32 4294967294, %s1249_s14   ;;  %s328_s24 = int_to_ptr.vmem [resolvable:$true] %s327_s24 }
  0x1e   : > { %s43_s21 = sadd.s32 1, %s1245_s13  ;;  %s52_s28 = sadd.s32 1, %s1237_s11 }
  0x1f   : > { %s325_s20 = sshll.u32 %s1608_s3, 4  ;;  %p45_p7 = scmp.ge.s32.totalorder %s43_s21, 2  ;;  %s326_s20 = int_to_ptr.hbm [resolvable:$true] %s325_s20 }
  0x20   : > { %895 = dma.hbm_to_vmem [thread:$0]  (!%p1358_p5), %s326_s20, 512, %s328_s24, [#allocation9], %s1252_s26, %s1252_s26, %s1253_s27  }
  0x21   : > { %p59_p8 = scmp.ne.s32.totalorder %s1237_s11, %s1233_s10  ;;  %p60_p9 = scmp.eq.s32.totalorder %s1249_s14, 0 }
  0x22   : > { %p65_p10 = scmp.ne.s32.totalorder %s1233_s10, %s1229_s30  ;;  %s1630_s21 = smov (%p45_p7, %s43_s21), 0 }
  0x23   : > { %1609 = sst [smem:[#allocation19_spill]] %s1630_s21  ;;  %p1385_p11 = por %p60_p9, %p59_p8 }
  0x24   : > { %p1391_p12 = por %p66_p1, %p65_p10  ;;  %s47_s26 = ssub.s32 %s1245_s13, %s1630_s21 }
  0x25   : > { %p217_p13 = scmp.eq.s32.totalorder %s1342_s15, 1  ;;  %p50_p0 = scmp.eq.s32.totalorder %s47_s26, 0 }
  0x26   : > { %p223_p2 = scmp.eq.s32.totalorder %s1594_s18, 1  ;;  %p913_p5 = scmp.lt.s32.totalorder %s1249_s14, 2 }
  0x27   : > { %p1400_p4 = por %p217_p13, %p59_p8  ;;  %s350_s17 = sand.u32 1, %s1237_s11  }
  0x28   : > { %s1406_s29 = scalar_select %p50_p0, %s1237_s11, %s52_s28  }
  0x29   : > { %p1408_p7 = por %p223_p2, %p65_p10  ;;  %s830_s20 = sshll.u32 %s350_s17, 3 }
  0x2a   : > { %s831_s23 = sshll.u32 %s1245_s13, 3  ;;  %s1614_s0 = sld [smem:[#allocation21_spill]] }
  0x2b   : > { %s354_s2 = scalar_lea.vmem [#allocation2], %s830_s20  ;;  %p897_p8 = pnand %p913_p5, %p1385_p11 }
  0x2c   : > { %s363_s18 = sshll.u32 %s354_s2, 4  ;;  %s351_s28 = scalar_lea.sflag [#allocation3], %s350_s17  ;;  %s364_s18 = int_to_ptr.vmem [resolvable:$true] %s363_s18 }
  0x2e   : > { %372 = sbr.rel (%p1350_p3) target bundleno = 361 (0x169), region = 48 }
  0x30   : > { %s359_s26 = scalar_lea.hbm %s1614_s0, %s831_s23 }
  0x31   : > { %s361_s3 = sshll.u32 %s359_s26, 4  ;;  %s362_s3 = int_to_ptr.hbm [resolvable:$true] %s361_s3 }
  0x32   : > { %899 = dma.hbm_to_vmem [thread:$0]  (!%p897_p8), %s362_s3, 128, %s364_s18, %s351_s28  }
  0x33   : > { %s1422_s21 = sand.u32 1, %s1233_s10  }
  0x34   : > { %s833_s1 = sshll.u32 %s1422_s21, 3  ;;  %s375_s23 = scalar_lea.sflag [#allocation3], %s1422_s21 }
  0x35   : > { %s378_s20 = scalar_lea.vmem [#allocation2], %s833_s1 }
  0x36   : > { %1208 = dma.done.wait (%p1391_p12), %s375_s23, 128  }
  0x37   : > { %1210 = vsyncadd (%p1391_p12), %s375_s23, 4294967168 }
  0x38   : > { %1212 = dma.done.wait (%p66_p1), [#allocation6], 1024  }
  0x39   : > { %1214 = vsyncadd (%p66_p1), [#allocation6], 4294966272 }
  0x3a   : > { %1216 = dma.done.wait (%p66_p1), [#allocation9], 512  }
  0x3b   : > { %1218 = vsyncadd (%p66_p1), [#allocation9], 4294966784  ;;  %v443_v0 = vld [vmem:[#allocation5 + $0x18] sm:$0xff]  ;;  %v442_v2 = vld [vmem:[#allocation5 + $0x10] sm:$0xff]  ;;  %vm448_vm0 = vcmask 261120   ;;  %s1615_s4 = sld [smem:[#allocation25_spill]] }
  0x3c   : > { %v493_v1 = vld [vmem:[#allocation7 + $0x18] sm:$0xff]  ;;  %464 = vmatpush.msra.mxu0 %v443_v0  ;;  %v492_v3 = vld [vmem:[#allocation7 + $0x10] sm:$0xff]  ;;  %v441_v4 = vld [vmem:[#allocation5 + $0x8] sm:$0xff]  ;;  %s1616_s5 = sld [smem:[#allocation26_spill]]  ;;  %s837_s25 = sshll.u32 %s1422_s21, 5  ;;  %vm472_vm1 = vcmask 64512  }
  0x3d   : > { %510 = vmatpush.msra.mxu1 %v493_v1  ;;  %v491_v5 = vld [vmem:[#allocation7 + $0x8] sm:$0xff]  ;;  %v538_v6 = vld [vmem:[#allocation8 + $0x18] sm:$0xff]  ;;  %v537_v7 = vld [vmem:[#allocation8 + $0x10] sm:$0xff]  ;;  %s1445_s22 = scalar_lea.vmem [#allocation10], %s837_s25  ;;  %s1256_s17 = smov 104  }
  0x3e   : > { %465 = vmatpush.msra.mxu0 %v442_v2  ;;  %v440_v8 = vld [vmem:[#allocation5] sm:$0xff]  ;;  %555 = vmatpush.msra.mxu2 %v538_v6  ;;  %v439_v10 = vld [vmem:[%s378_s20] sm:$0xff]  ;;  %v536_v11 = vld [vmem:[#allocation8 + $0x8] sm:$0xff]  ;;  %s1257_s24 = smov 120   ;;  %s1449_s26 = scalar_lea.vmem [#allocation11], %s837_s25 }
  0x3f   : > { %511 = vmatpush.msra.mxu1 %v492_v3  ;;  %v490_v9 = vld [vmem:[#allocation7] sm:$0xff]  ;;  %s1258_s28 = smov 112   ;;  %v978_v19 = vld [vmem:[%s1590_s6] ss:$0 sm:$0xff]  ;;  %s1456_s20 = scalar_lea.vmem [#allocation13], %s837_s25 }
  0x40   : > { %466 = vmatpush.msra.mxu0 %v441_v4  ;;  %556 = vmatpush.msra.mxu2 %v537_v7  ;;  %v535_v12 = vld [vmem:[#allocation8] sm:$0xff]  ;;  %s1467_s2 = sshll.u32 %s1241_s12, 5  ;;  %s604_s3 = sshll.u32 %s1445_s22, 4  ;;  %s1484_s3 = int_to_ptr.vmem [resolvable:$true] %s604_s3 }
  0x41   : > { %512 = vmatpush.msra.mxu1 %v491_v5  ;;  %v976_v13 = vld [vmem:[%s1615_s4] ss:$0 sm:$0xff]  ;;  %s621_s25 = scalar_lea.hbm %s1592_s8, %s1467_s2  ;;  %s585_s1 = sand.u32 1, %s1342_s15  }
  0x42   : > { %467 = vmatpush.msra.mxu0 %v440_v8  ;;  %557 = vmatpush.msra.mxu2 %v536_v11  ;;  %v977_v14 = vld [vmem:[%s1616_s5] ss:$0 sm:$0xff]  ;;  %s1486_s23 = sshll.u32 %s621_s25, 4  ;;  %s625_s23 = int_to_ptr.hbm [resolvable:$true] %s1486_s23 }
  0x43   : > { %513 = vmatpush.msra.mxu1 %v490_v9  ;;  %840 = vmatmul.msk.f32.vlgmr.msra.gmra.mxu0 %vm448_vm0, %v439_v10  ;;  %s1113_s25 = sshra.s32 %s625_s23, 4  ;;  %s1114_s25 = int_to_ptr.hbm [resolvable:$true] %s1113_s25 }
  0x44   : > { %844 = vmatmul.msk.f32.vlgmr.msra.gmra.mxu1 %vm448_vm0, %v439_v10  ;;  %558 = vmatpush.msra.mxu2 %v535_v12  ;;  %s1115_s12 = scalar_lea.hbm %s1114_s25, 32  ;;  %p1120_p10 = scmp.lt.s32.totalorder %s1114_s25, %s1592_s8 }
  0x45   : > { %848 = vmatmul.msk.f32.vlgmr.msra.gmra.mxu2 %vm448_vm0, %v439_v10  ;;  %p1116_p1 = scmp.ne.s32.totalorder %s1114_s25, %s1115_s12 }
  0x47   : > { %p1117_p3 = pnand %p1116_p1, %p1400_p4 }
  0x49   : > { %p1118_p9 = pneg %p1117_p3 }
  0xc0   : > { %v469_v15 = vpop.f32.mrf.mxu0 }
  0xc1   : > { %v515_v16 = vpop.f32.mrf.mxu1  ;;  %v470_v17 = vadd.f32 %v976_v13, %v469_v15 }
  0xc2   : > { %v516_v18 = vadd.f32 %v977_v14, %v515_v16 }
  0xc3   : > { %473 = vst.msk [vmem:[%s1445_s22] sm:$0xff] %vm472_vm1, %v470_v17  ;;  %480 = vrot.lane.b32.xlu2 %v470_v17, %s1258_s28 }
  0xc4   : > { %530 = vrot.lane.b32.xlu1 %v516_v18, %s1256_s17  ;;  %520 = vrot.lane.b32.xlu0 %v516_v18, %s1257_s24  ;;  %518 = vst.msk [vmem:[%s1449_s26] sm:$0xff] %vm472_vm1, %v516_v18 }
  0xc8   : > { %v560_v20 = vpop.f32.mrf.mxu2 }
  0xc9   : > { %v561_v21 = vadd.f32 %v978_v19, %v560_v20 }
  0xcb   : > { %485 = vrot.lane.b32.xlu2 %v470_v17, %s1256_s17  ;;  %563 = vst.msk [vmem:[%s1456_s20] sm:$0xff] %vm472_vm1, %v561_v21 }
  0xcc   : > { %525 = vrot.lane.b32.xlu0 %v516_v18, %s1258_s28  ;;  %475 = vrot.lane.b32.xlu1 %v470_v17, %s1257_s24 }
  0xd3   : > { %575 = vrot.lane.b32.xlu2 %v561_v21, %s1256_s17  ;;  %s622_s17 = sshll.u32 %s1449_s26, 4  ;;  %s623_s17 = int_to_ptr.vmem [resolvable:$true] %s622_s17 }
  0xd4   : > { %565 = vrot.lane.b32.xlu0 %v561_v21, %s1257_s24  ;;  %570 = vrot.lane.b32.xlu1 %v561_v21, %s1258_s28  ;;  %s603_s28 = scalar_lea.hbm %s1591_s7, %s1467_s2  ;;  %s1500_s24 = scalar_lea.sflag [#allocation12], %s585_s1 }
  0xd5   : > { %s1488_s0 = sshll.u32 %s603_s28, 4 }
  0xd6   : > { %1617 = sst [smem:[#allocation20_spill]] %s1488_s0 }
 0x11d   : > { %v481_v22 = vpop.permute.xlu2 %480 }
 0x11e   : > { %842 = vst.msk [vmem:[%s1445_s22 + $0x10] sm:$0xff] %vm472_vm1, %v481_v22 }
 0x125   : > { %v486_v23 = vpop.permute.xlu2 %485 }
 0x126   : > { %843 = vst.msk [vmem:[%s1445_s22 + $0x18] sm:$0xff] %vm472_vm1, %v486_v23 }
 0x12d   : > { %v576_v24 = vpop.permute.xlu2 %575 }
 0x12e   : > { %851 = vst.msk [vmem:[%s1456_s20 + $0x18] sm:$0xff] %vm472_vm1, %v576_v24 }
 0x136   : > { %v531_v25 = vpop.permute.xlu1 %530  ;;  %v521_v26 = vpop.permute.xlu0 %520 }
 0x137   : > { %847 = vst.msk [vmem:[%s1449_s26 + $0x18] sm:$0xff] %vm472_vm1, %v531_v25 }
 0x138   : > { %845 = vst.msk [vmem:[%s1449_s26 + $0x8] sm:$0xff] %vm472_vm1, %v521_v26 }
 0x13e   : > { %v526_v27 = vpop.permute.xlu0 %525  ;;  %v476_v28 = vpop.permute.xlu1 %475 }
 0x13f   : > { %846 = vst.msk [vmem:[%s1449_s26 + $0x10] sm:$0xff] %vm472_vm1, %v526_v27  ;;  %s1119_s26 = scalar_lea.hbm %s1592_s8, 64 }
 0x140   : > { %841 = vst.msk [vmem:[%s1445_s22 + $0x8] sm:$0xff] %vm472_vm1, %v476_v28  ;;  %p1121_p11 = scmp.lt.s32.totalorder %s1119_s26, %s1115_s12 }
 0x142   : > { %p1122_p12 = por %p1121_p11, %p1120_p10 }
 0x144   : > { %p1123_p13 = pnand %p1122_p12, %p1118_p9 }
 0x146   : > { %1126 = shalt.err (!%p1123_p13)
}
 0x147   : > { %s1259_s22 = smov 128   ;;  %s1618_s1 = sld [smem:[#allocation20_spill]] }
 0x148   : > { %s1260_s19 = smov 8   ;;  %s581_s4 = scalar_lea.sflag [#allocation4], %s1422_s21 }
 0x149   : > { %881 = dma.vmem_to_hbm [thread:$0]  (%p1400_p4), %s623_s17, 512, %s625_s23, %s1500_s24, %s1259_s22, %s1259_s22, %s1260_s19  }
 0x14a   : > { %s1147_s28 = scalar_lea.hbm %s1591_s7, 64 }
 0x14d   : > { %s1619_s15 = int_to_ptr.hbm [resolvable:$true] %s1618_s1 }
 0x14e   : > { %s1141_s0 = sshra.s32 %s1619_s15, 4  ;;  %s1142_s0 = int_to_ptr.hbm [resolvable:$true] %s1141_s0 }
 0x14f   : > { %s1143_s5 = scalar_lea.hbm %s1142_s0, 32  ;;  %p1148_p8 = scmp.lt.s32.totalorder %s1142_s0, %s1591_s7 }
 0x150   : > { %p1144_p0 = scmp.ne.s32.totalorder %s1142_s0, %s1143_s5  ;;  %p1149_p1 = scmp.lt.s32.totalorder %s1147_s28, %s1143_s5 }
 0x152   : > { %p1145_p2 = pnand %p1144_p0, %p1400_p4  ;;  %p1150_p3 = por %p1149_p1, %p1148_p8 }
 0x154   : > { %p1146_p5 = pneg %p1145_p2 }
 0x156   : > { %p1151_p9 = pnand %p1150_p3, %p1146_p5 }
 0x158   : > { %1154 = shalt.err (!%p1151_p9)
}
 0x159   : > { %s1620_s21 = smov %s1619_s15  ;;  %s640_s17 = sshll.u32 %s1456_s20, 4  ;;  %v566_v29 = vpop.permute.xlu0 %565  ;;  %v571_v30 = vpop.permute.xlu1 %570  ;;  %s641_s17 = int_to_ptr.vmem [resolvable:$true] %s640_s17 }
 0x15a   : > { %880 = dma.vmem_to_hbm [thread:$0]  (%p1400_p4), %s1484_s3, 512, %s1620_s21, %s581_s4, %s1259_s22, %s1259_s22, %s1260_s19  }
 0x15b   : > { %s1621_s15 = scalar_lea.hbm %s1593_s9, %s1467_s2  ;;  %849 = vst.msk [vmem:[%s1456_s20 + $0x8] sm:$0xff] %vm472_vm1, %v566_v29  ;;  %s1175_s2 = scalar_lea.hbm %s1593_s9, 64 }
 0x15c   : > { %s642_s0 = sshll.u32 %s1621_s15, 4  ;;  %850 = vst.msk [vmem:[%s1456_s20 + $0x10] sm:$0xff] %vm472_vm1, %v571_v30  ;;  %s643_s0 = int_to_ptr.hbm [resolvable:$true] %s642_s0 }
 0x15d   : > { %s1169_s1 = sshra.s32 %s643_s0, 4  ;;  %s1170_s1 = int_to_ptr.hbm [resolvable:$true] %s1169_s1 }
 0x15e   : > { %s1171_s5 = scalar_lea.hbm %s1170_s1, 32  ;;  %p1176_p13 = scmp.lt.s32.totalorder %s1170_s1, %s1593_s9 }
 0x15f   : > { %p1172_p10 = scmp.ne.s32.totalorder %s1170_s1, %s1171_s5  ;;  %p1177_p0 = scmp.lt.s32.totalorder %s1175_s2, %s1171_s5 }
 0x161   : > { %p1173_p11 = pnand %p1172_p10, %p1400_p4  ;;  %p1178_p2 = por %p1177_p0, %p1176_p13 }
 0x163   : > { %p1174_p12 = pneg %p1173_p11 }
 0x165   : > { %p1179_p5 = pnand %p1178_p2, %p1174_p12 }
 0x167   : > { %1182 = shalt.err (!%p1179_p5)
}
 0x168   : > { %882 = dma.vmem_to_hbm [thread:$0]  (%p1400_p4), %s641_s17, 512, %s643_s0, %s1500_s24, %s1259_s22, %s1259_s22, %s1260_s19  }
 0x169 PF: > { %s657_s20 = sand.u32 1, %s1229_s30   ;;  %p901_p8 = pnand %p829_p6, %p1408_p7 }
 0x16a   : > { %s658_s28 = scalar_lea.sflag [#allocation4], %s657_s20 }
 0x16b   : > { %p902_p1 = pneg %p901_p8 }
 0x16d   : > { %1220 = dma.done.wait (%p902_p1), %s658_s28, 512  }
 0x16e   : > { %1222 = vsyncadd (%p902_p1), %s658_s28, 4294966784  ;;  %s1622_s26 = sadd.s32 4294967294, %s1249_s14  }
 0x16f   : > { %s667_s27 = sand.u32 1, %s1622_s26  }
 0x170   : > { %s668_s21 = scalar_lea.sflag [#allocation12], %s667_s27 }
 0x171   : > { %1224 = dma.done.wait (%p902_p1), %s668_s21, 1024  }
 0x172   : > { %1226 = vsyncadd (%p902_p1), %s668_s21, 4294966272  ;;  %s31_s14 = sadd.s32 1, %s1249_s14   ;;  %s1623_s16 = sld [smem:[#allocation19_spill]] }
 0x173   : > { %p28_p4 = scmp.ge.s32.totalorder %s31_s14, 4   ;;  %s1624_s30 = smov %s1233_s10 }
 0x174   : > { %s1625_s10 = smov %s1237_s11  ;;  %s1626_s11 = smov %s1406_s29 }
 0x175   : > { %s1627_s12 = smov %s1245_s13  ;;  %30 = sbr.rel (!%p28_p4) target bundleno = 17 (0x11), region = 146 }
 0x178   : > { %s1628_s13 = smov %s1623_s16 }
 0x17a   :  { %684 = vsyncpa [#allocation3], 1 }
 0x17b   :  { %686 = vsyncpa [#allocation3 + $0x1], 1 }
 0x17c   :  { %687 = vsyncpa [#allocation6], 1 }
 0x17d   :  { %688 = vsyncpa [#allocation9], 1 }
 0x17e   :  { %689 = vsyncpa [#allocation4], 1 }
 0x17f   :  { %691 = vsyncpa [#allocation4 + $0x1], 1 }
 0x180   :  { %692 = vsyncpa [#allocation12], 1 }
 0x181   :  { %694 = vsyncpa [#allocation12 + $0x1], 1 }

</bundles_post_ra>
